<compile_context>
chip_gen: v5e
topology: v5e:2x2
jax: 0.10.0
libtpu: 0.0.40
codegen_flags: <defaults>
</compile_context>

<pallas_src>
import functools

import jax
import jax.numpy as jnp
from jax.experimental import pallas as pl
from jax.experimental.pallas import tpu as pltpu

_LANE = 128
_SUBLANE = 8


def _ceil_to(n, m):
    return ((n + m - 1) // m) * m


def _pad2d(a, rows, cols):
    return jnp.pad(a, ((0, rows - a.shape[0]), (0, cols - a.shape[1])))


@functools.lru_cache(maxsize=1)
def _vmem_capacity_bytes():
    # Per-generation physical VMEM (128 MiB v5e/v6e, 64 MiB per-TC v7x).
    try:
        return int(pltpu.get_tpu_info().vmem_capacity_bytes)
    except Exception:  # pragma: no cover - conservative fallback
        return 64 * 2**20


# --------------------------------------------------------------------------- #
# Kernel: fused Linear -> ReLU -> Linear -> ReLU -> Linear on one batch tile. #
# --------------------------------------------------------------------------- #
def _adv_net_kernel(x_ref, w1_ref, b1_ref, w2_ref, b2_ref, w3_ref, b3_ref, o_ref):
    # x arrives in f32; cast to the MXU compute dtype in-kernel (VPU filler).
    x = x_ref[...].astype(w1_ref.dtype)

    # Layer 1: Linear + ReLU  (dropout1 is identity at inference).
    h1 = jnp.dot(x, w1_ref[...], preferred_element_type=jnp.float32)
    h1 = jnp.maximum(h1 + b1_ref[...], 0.0)

    # Layer 2: Linear + ReLU  (dropout2 is identity at inference).
    h2 = jnp.dot(h1.astype(w2_ref.dtype), w2_ref[...],
                 preferred_element_type=jnp.float32)
    h2 = jnp.maximum(h2 + b2_ref[...], 0.0)

    # Layer 3: Linear (domain logits); lane-dense padded store.
    y = jnp.dot(h2.astype(w3_ref.dtype), w3_ref[...],
                preferred_element_type=jnp.float32)
    o_ref[...] = (y + b3_ref[...]).astype(o_ref.dtype)


# --------------------------------------------------------------------------- #
# One-time parameter preparation (hoisted out of the per-call forward path).  #
# --------------------------------------------------------------------------- #
def prepare_adversarial_params(params, compute_dtype=jnp.bfloat16):
    """Zero-pad feature dims to the 128-lane width and cast weights to the MXU
    compute dtype once. Biases stay f32 (f32 bias-add/ReLU is safe on v5e)."""
    w1, b1 = params["w1"], params["b1"]
    w2, b2 = params["w2"], params["b2"]
    w3, b3 = params["w3"], params["b3"]

    in_p = _ceil_to(w1.shape[0], _LANE)
    h_p = _ceil_to(w1.shape[1], _LANE)
    nd_p = _ceil_to(w3.shape[1], _LANE)

    padded = {
        "w1": _pad2d(w1, in_p, h_p).astype(compute_dtype),
        "b1": _pad2d(b1.reshape(1, -1), 1, h_p).astype(jnp.float32),
        "w2": _pad2d(w2, h_p, h_p).astype(compute_dtype),
        "b2": _pad2d(b2.reshape(1, -1), 1, h_p).astype(jnp.float32),
        "w3": _pad2d(w3, h_p, nd_p).astype(compute_dtype),
        "b3": _pad2d(b3.reshape(1, -1), 1, nd_p).astype(jnp.float32),
    }
    ndomains = int(w3.shape[1])
    return padded, ndomains


# --------------------------------------------------------------------------- #
# Forward                                                                     #
# --------------------------------------------------------------------------- #
@functools.partial(
    jax.jit, static_argnames=("ndomains", "block_b", "single_buffer_weights"))
def adversarial_network_forward(x, padded_params, *, ndomains, block_b=512,
                                single_buffer_weights=True):
    """x: [B, in_feature] f32. padded_params: output of prepare_adversarial_params."""
    w1p, b1p = padded_params["w1"], padded_params["b1"]
    w2p, b2p = padded_params["w2"], padded_params["b2"]
    w3p, b3p = padded_params["w3"], padded_params["b3"]

    B, in_feature = x.shape
    in_p, h_p = w1p.shape
    nd_p = w3p.shape[1]

    # --- batch tiling: prefer >= 2 grid steps so both v7x TensorCores work ----
    b_al = _ceil_to(B, _SUBLANE)
    tb = min(int(block_b), b_al)
    if 2 * _SUBLANE <= b_al <= 2 * int(block_b):
        tb = min(tb, _ceil_to((b_al + 1) // 2, _SUBLANE))
    tb = _ceil_to(tb, _SUBLANE)
    b_p = _ceil_to(b_al, tb)
    grid = (b_p // tb,)

    # --- pad x (kept f32; the in-kernel cast feeds the MXU) -------------------
    if (b_p, in_p) != (B, in_feature):
        xp = jnp.pad(x, ((0, b_p - B), (0, in_p - in_feature)))
    else:
        xp = x
    xp = xp.astype(jnp.float32)

    # --- VMEM budget: resident weights + double-buffered activation tiles -----
    w_itemsize = jnp.dtype(w1p.dtype).itemsize
    wbuf = 1 if single_buffer_weights else 2
    w_bytes = (w1p.size + w2p.size + w3p.size) * w_itemsize
    bias_bytes = (b1p.size + b2p.size + b3p.size) * 4
    est = (wbuf * (w_bytes + bias_bytes)
           + 2 * tb * in_p * 4                 # double-buffered f32 x tiles
           + 2 * tb * nd_p * 4                 # double-buffered f32 out tiles
           + tb * in_p * w_itemsize            # in-kernel cast copy of x tile
           + 2 * tb * h_p * (4 + w_itemsize)   # h1/h2 f32 + re-cast copies
           + tb * nd_p * 4)                    # y f32 before store cast
    cap = max(16 * 2**20, _vmem_capacity_bytes() - 8 * 2**20)
    vmem_limit = int(min(cap, max(est + 4 * 2**20, 32 * 2**20)))

    # --- specs: batch-tiled activations, resident (single-buffered) weights ---
    def const_spec(a):
        if single_buffer_weights:
            return pl.BlockSpec(a.shape, lambda i: (0, 0),
                                pipeline_mode=pl.Buffered(1))
        return pl.BlockSpec(a.shape, lambda i: (0, 0))

    act_in_spec = pl.BlockSpec((tb, in_p), lambda i: (i, 0))
    out_spec = pl.BlockSpec((tb, nd_p), lambda i: (i, 0))

    y_pad = pl.pallas_call(
        _adv_net_kernel,
        out_shape=jax.ShapeDtypeStruct((b_p, nd_p), jnp.float32),
        grid=grid,
        in_specs=[
            act_in_spec,
            const_spec(w1p), const_spec(b1p),
            const_spec(w2p), const_spec(b2p),
            const_spec(w3p), const_spec(b3p),
        ],
        out_specs=out_spec,
        compiler_params=pltpu.CompilerParams(
            dimension_semantics=("parallel",),
            vmem_limit_bytes=vmem_limit,
        ),
    )(xp, w1p, b1p, w2p, b2p, w3p, b3p)

    # Slice the zero-padded rows/lanes off outside the kernel.
    return y_pad[:B, :ndomains]


def adversarial_network_forward_auto(x, padded_params, *, ndomains, block_b=512):
    """Prefer the VMEM-lean single-buffered-weights variant; fall back cleanly
    if this jax build rejects pipeline_mode=pl.Buffered on pallas_call specs."""
    try:
        y = adversarial_network_forward(
            x, padded_params, ndomains=ndomains, block_b=block_b,
            single_buffer_weights=True)
        return jax.block_until_ready(y)
    except Exception:  # feature probe: older builds without pipeline_mode
        y = adversarial_network_forward(
            x, padded_params, ndomains=ndomains, block_b=block_b,
            single_buffer_weights=False)
        return jax.block_until_ready(y)


# --------------------------------------------------------------------------- #
# Init helpers (match the PyTorch module's init_weights for Linear layers).   #
# --------------------------------------------------------------------------- #
def xavier_normal(key, fan_in, fan_out):
    # nn.init.xavier_normal_ on a PyTorch [out, in] weight; stored transposed
    # as [in, out] here (std is symmetric in fan_in/fan_out).
    std = (2.0 / (fan_in + fan_out)) ** 0.5
    return std * jax.random.normal(key, (fan_in, fan_out), dtype=jnp.float32)


def init_adversarial_network(key, in_feature, hidden_size, ndomains):
    k1, k2, k3 = jax.random.split(key, 3)
    return {
        "w1": xavier_normal(k1, in_feature, hidden_size),
        "b1": jnp.zeros((1, hidden_size), jnp.float32),
        "w2": xavier_normal(k2, hidden_size, hidden_size),
        "b2": jnp.zeros((1, hidden_size), jnp.float32),
        "w3": xavier_normal(k3, hidden_size, ndomains),
        "b3": jnp.zeros((1, ndomains), jnp.float32),
    }


if __name__ == "__main__":
    in_feature, hidden_size, ndomains = 64, 32, 4
    batch = 8

    key = jax.random.PRNGKey(0)
    kx, kp = jax.random.split(key)

    x = jax.random.normal(kx, (batch, in_feature), dtype=jnp.float32)
    params = init_adversarial_network(kp, in_feature, hidden_size, ndomains)

    # One-time padding/casting of the parameters (hoisted out of the forward).
    padded_params, nd = prepare_adversarial_params(params)

    y = adversarial_network_forward_auto(x, padded_params, ndomains=nd)

    # Reference in plain JAX f32 (eval-mode dropout == identity, GRL is
    # backward-only). bf16 MXU inputs in the kernel -> loose tolerance.
    h1 = jnp.maximum(x @ params["w1"] + params["b1"], 0.0)
    h2 = jnp.maximum(h1 @ params["w2"] + params["b2"], 0.0)
    y_ref = h2 @ params["w3"] + params["b3"]

    assert y.shape == (batch, ndomains)
    assert jnp.allclose(y, y_ref, atol=5e-2, rtol=5e-2), (
        float(jnp.max(jnp.abs(y - y_ref))))

    print("KERNEL_OK")
</pallas_src>

<mosaic_0001>
module attributes {stable_mosaic.version = 11 : i64} {
  func.func @_adv_net_kernel(%arg0: i32, %arg1: memref<8x128xf32, #tpu.memory_space<vmem>>, %arg2: memref<128x128xbf16, #tpu.memory_space<vmem>>, %arg3: memref<1x128xf32, #tpu.memory_space<vmem>>, %arg4: memref<128x128xbf16, #tpu.memory_space<vmem>>, %arg5: memref<1x128xf32, #tpu.memory_space<vmem>>, %arg6: memref<128x128xbf16, #tpu.memory_space<vmem>>, %arg7: memref<1x128xf32, #tpu.memory_space<vmem>>, %arg8: memref<8x128xf32, #tpu.memory_space<vmem>>) attributes {dimension_semantics = [#tpu.dimension_semantics<parallel>], iteration_bounds = array<i64: 1>, scalar_prefetch = 0 : i64, scratch_operands = 0 : i64, tpu.core_type = #tpu.core_type<tc>, window_params = [{transform_indices = @transform_0, window_bounds = array<i64: 8, 128>}, {pipeline_mode = #tpu.pipeline_mode<synchronous>, transform_indices = @transform_1, window_bounds = array<i64: 128, 128>}, {pipeline_mode = #tpu.pipeline_mode<synchronous>, transform_indices = @transform_2, window_bounds = array<i64: 1, 128>}, {pipeline_mode = #tpu.pipeline_mode<synchronous>, transform_indices = @transform_3, window_bounds = array<i64: 128, 128>}, {pipeline_mode = #tpu.pipeline_mode<synchronous>, transform_indices = @transform_4, window_bounds = array<i64: 1, 128>}, {pipeline_mode = #tpu.pipeline_mode<synchronous>, transform_indices = @transform_5, window_bounds = array<i64: 128, 128>}, {pipeline_mode = #tpu.pipeline_mode<synchronous>, transform_indices = @transform_6, window_bounds = array<i64: 1, 128>}, {transform_indices = @transform_7, window_bounds = array<i64: 8, 128>}]} {
    %c0 = arith.constant 0 : index
    %c0_0 = arith.constant 0 : index
    %0 = vector.load %arg1[%c0, %c0_0] : memref<8x128xf32, #tpu.memory_space<vmem>>, vector<8x128xf32>
    %1 = arith.truncf %0 : vector<8x128xf32> to vector<8x128xbf16>
    %c0_1 = arith.constant 0 : index
    %c0_2 = arith.constant 0 : index
    %2 = vector.load %arg2[%c0_1, %c0_2] : memref<128x128xbf16, #tpu.memory_space<vmem>>, vector<128x128xbf16>
    %cst = arith.constant dense<0.000000e+00> : vector<8x128xf32>
    %3 = tpu.matmul %1, %2, %cst {dimension_numbers = #tpu.dot_dimension_numbers<[1], [0], [0], [1], [0, 0, 1, 1], [], []>} : vector<8x128xbf16>, vector<128x128xbf16>, vector<8x128xf32> -> vector<8x128xf32>
    %c0_3 = arith.constant 0 : index
    %c0_4 = arith.constant 0 : index
    %4 = vector.load %arg3[%c0_3, %c0_4] : memref<1x128xf32, #tpu.memory_space<vmem>>, vector<1x128xf32>
    %5 = vector.broadcast %4 : vector<1x128xf32> to vector<8x128xf32>
    %6 = arith.addf %3, %5 : vector<8x128xf32>
    %cst_5 = arith.constant 0.000000e+00 : f32
    %7 = vector.broadcast %cst_5 : f32 to vector<8x128xf32>
    %8 = arith.maximumf %6, %7 : vector<8x128xf32>
    %9 = arith.truncf %8 : vector<8x128xf32> to vector<8x128xbf16>
    %c0_6 = arith.constant 0 : index
    %c0_7 = arith.constant 0 : index
    %10 = vector.load %arg4[%c0_6, %c0_7] : memref<128x128xbf16, #tpu.memory_space<vmem>>, vector<128x128xbf16>
    %cst_8 = arith.constant dense<0.000000e+00> : vector<8x128xf32>
    %11 = tpu.matmul %9, %10, %cst_8 {dimension_numbers = #tpu.dot_dimension_numbers<[1], [0], [0], [1], [0, 0, 1, 1], [], []>} : vector<8x128xbf16>, vector<128x128xbf16>, vector<8x128xf32> -> vector<8x128xf32>
    %c0_9 = arith.constant 0 : index
    %c0_10 = arith.constant 0 : index
    %12 = vector.load %arg5[%c0_9, %c0_10] : memref<1x128xf32, #tpu.memory_space<vmem>>, vector<1x128xf32>
    %13 = vector.broadcast %12 : vector<1x128xf32> to vector<8x128xf32>
    %14 = arith.addf %11, %13 : vector<8x128xf32>
    %cst_11 = arith.constant 0.000000e+00 : f32
    %15 = vector.broadcast %cst_11 : f32 to vector<8x128xf32>
    %16 = arith.maximumf %14, %15 : vector<8x128xf32>
    %17 = arith.truncf %16 : vector<8x128xf32> to vector<8x128xbf16>
    %c0_12 = arith.constant 0 : index
    %c0_13 = arith.constant 0 : index
    %18 = vector.load %arg6[%c0_12, %c0_13] : memref<128x128xbf16, #tpu.memory_space<vmem>>, vector<128x128xbf16>
    %cst_14 = arith.constant dense<0.000000e+00> : vector<8x128xf32>
    %19 = tpu.matmul %17, %18, %cst_14 {dimension_numbers = #tpu.dot_dimension_numbers<[1], [0], [0], [1], [0, 0, 1, 1], [], []>} : vector<8x128xbf16>, vector<128x128xbf16>, vector<8x128xf32> -> vector<8x128xf32>
    %c0_15 = arith.constant 0 : index
    %c0_16 = arith.constant 0 : index
    %20 = vector.load %arg7[%c0_15, %c0_16] : memref<1x128xf32, #tpu.memory_space<vmem>>, vector<1x128xf32>
    %21 = vector.broadcast %20 : vector<1x128xf32> to vector<8x128xf32>
    %22 = arith.addf %19, %21 : vector<8x128xf32>
    %c0_17 = arith.constant 0 : index
    %c0_18 = arith.constant 0 : index
    %23 = vector.load %arg8[%c0_17, %c0_18] : memref<8x128xf32, #tpu.memory_space<vmem>>, vector<8x128xf32>
    tpu.vector_store %arg8[%c0_17, %c0_18], %22 {strides = array<i32>} : memref<8x128xf32, #tpu.memory_space<vmem>>, vector<8x128xf32>,
    return
  }
  func.func @transform_0(%arg0: i32) -> (i32, i32) {
    %c0_i32 = arith.constant 0 : i32
    %c0_i32_0 = arith.constant 0 : i32
    return %arg0, %c0_i32 : i32, i32
  }
  func.func @transform_1(%arg0: i32) -> (i32, i32) {
    %c0_i32 = arith.constant 0 : i32
    %c0_i32_0 = arith.constant 0 : i32
    %c0_i32_1 = arith.constant 0 : i32
    return %c0_i32, %c0_i32_0 : i32, i32
  }
  func.func @transform_2(%arg0: i32) -> (i32, i32) {
    %c0_i32 = arith.constant 0 : i32
    %c0_i32_0 = arith.constant 0 : i32
    %c0_i32_1 = arith.constant 0 : i32
    return %c0_i32, %c0_i32_0 : i32, i32
  }
  func.func @transform_3(%arg0: i32) -> (i32, i32) {
    %c0_i32 = arith.constant 0 : i32
    %c0_i32_0 = arith.constant 0 : i32
    %c0_i32_1 = arith.constant 0 : i32
    return %c0_i32, %c0_i32_0 : i32, i32
  }
  func.func @transform_4(%arg0: i32) -> (i32, i32) {
    %c0_i32 = arith.constant 0 : i32
    %c0_i32_0 = arith.constant 0 : i32
    %c0_i32_1 = arith.constant 0 : i32
    return %c0_i32, %c0_i32_0 : i32, i32
  }
  func.func @transform_5(%arg0: i32) -> (i32, i32) {
    %c0_i32 = arith.constant 0 : i32
    %c0_i32_0 = arith.constant 0 : i32
    %c0_i32_1 = arith.constant 0 : i32
    return %c0_i32, %c0_i32_0 : i32, i32
  }
  func.func @transform_6(%arg0: i32) -> (i32, i32) {
    %c0_i32 = arith.constant 0 : i32
    %c0_i32_0 = arith.constant 0 : i32
    %c0_i32_1 = arith.constant 0 : i32
    return %c0_i32, %c0_i32_0 : i32, i32
  }
  func.func @transform_7(%arg0: i32) -> (i32, i32) {
    %c0_i32 = arith.constant 0 : i32
    %c0_i32_0 = arith.constant 0 : i32
    return %arg0, %c0_i32 : i32, i32
  }
}

module attributes {stable_mosaic.version = 11 : i64} {
  func.func @_adv_net_kernel(%arg0: i32, %arg1: memref<8x128xf32, #tpu.memory_space<vmem>>, %arg2: memref<128x128xbf16, #tpu.memory_space<vmem>>, %arg3: memref<1x128xf32, #tpu.memory_space<vmem>>, %arg4: memref<128x128xbf16, #tpu.memory_space<vmem>>, %arg5: memref<1x128xf32, #tpu.memory_space<vmem>>, %arg6: memref<128x128xbf16, #tpu.memory_space<vmem>>, %arg7: memref<1x128xf32, #tpu.memory_space<vmem>>, %arg8: memref<8x128xf32, #tpu.memory_space<vmem>>) attributes {dimension_semantics = [#tpu.dimension_semantics<parallel>], iteration_bounds = array<i64: 1>, scalar_prefetch = 0 : i64, scratch_operands = 0 : i64, tpu.core_type = #tpu.core_type<tc>, window_params = [{transform_indices = @transform_0, window_bounds = array<i64: 8, 128>}, {pipeline_mode = #tpu.pipeline_mode<synchronous>, transform_indices = @transform_1, window_bounds = array<i64: 128, 128>}, {pipeline_mode = #tpu.pipeline_mode<synchronous>, transform_indices = @transform_2, window_bounds = array<i64: 1, 128>}, {pipeline_mode = #tpu.pipeline_mode<synchronous>, transform_indices = @transform_3, window_bounds = array<i64: 128, 128>}, {pipeline_mode = #tpu.pipeline_mode<synchronous>, transform_indices = @transform_4, window_bounds = array<i64: 1, 128>}, {pipeline_mode = #tpu.pipeline_mode<synchronous>, transform_indices = @transform_5, window_bounds = array<i64: 128, 128>}, {pipeline_mode = #tpu.pipeline_mode<synchronous>, transform_indices = @transform_6, window_bounds = array<i64: 1, 128>}, {transform_indices = @transform_7, window_bounds = array<i64: 8, 128>}]} {
    %c0 = arith.constant 0 : index
    %c0_0 = arith.constant 0 : index
    %0 = vector.load %arg1[%c0, %c0_0] : memref<8x128xf32, #tpu.memory_space<vmem>>, vector<8x128xf32>
    %1 = arith.truncf %0 : vector<8x128xf32> to vector<8x128xbf16>
    %c0_1 = arith.constant 0 : index
    %c0_2 = arith.constant 0 : index
    %2 = vector.load %arg2[%c0_1, %c0_2] : memref<128x128xbf16, #tpu.memory_space<vmem>>, vector<128x128xbf16>
    %cst = arith.constant dense<0.000000e+00> : vector<8x128xf32>
    %3 = tpu.matmul %1, %2, %cst {dimension_numbers = #tpu.dot_dimension_numbers<[1], [0], [0], [1], [0, 0, 1, 1], [], []>} : vector<8x128xbf16>, vector<128x128xbf16>, vector<8x128xf32> -> vector<8x128xf32>
    %c0_3 = arith.constant 0 : index
    %c0_4 = arith.constant 0 : index
    %4 = vector.load %arg3[%c0_3, %c0_4] : memref<1x128xf32, #tpu.memory_space<vmem>>, vector<1x128xf32>
    %5 = vector.broadcast %4 : vector<1x128xf32> to vector<8x128xf32>
    %6 = arith.addf %3, %5 : vector<8x128xf32>
    %cst_5 = arith.constant 0.000000e+00 : f32
    %7 = vector.broadcast %cst_5 : f32 to vector<8x128xf32>
    %8 = arith.maximumf %6, %7 : vector<8x128xf32>
    %9 = arith.truncf %8 : vector<8x128xf32> to vector<8x128xbf16>
    %c0_6 = arith.constant 0 : index
    %c0_7 = arith.constant 0 : index
    %10 = vector.load %arg4[%c0_6, %c0_7] : memref<128x128xbf16, #tpu.memory_space<vmem>>, vector<128x128xbf16>
    %cst_8 = arith.constant dense<0.000000e+00> : vector<8x128xf32>
    %11 = tpu.matmul %9, %10, %cst_8 {dimension_numbers = #tpu.dot_dimension_numbers<[1], [0], [0], [1], [0, 0, 1, 1], [], []>} : vector<8x128xbf16>, vector<128x128xbf16>, vector<8x128xf32> -> vector<8x128xf32>
    %c0_9 = arith.constant 0 : index
    %c0_10 = arith.constant 0 : index
    %12 = vector.load %arg5[%c0_9, %c0_10] : memref<1x128xf32, #tpu.memory_space<vmem>>, vector<1x128xf32>
    %13 = vector.broadcast %12 : vector<1x128xf32> to vector<8x128xf32>
    %14 = arith.addf %11, %13 : vector<8x128xf32>
    %cst_11 = arith.constant 0.000000e+00 : f32
    %15 = vector.broadcast %cst_11 : f32 to vector<8x128xf32>
    %16 = arith.maximumf %14, %15 : vector<8x128xf32>
    %17 = arith.truncf %16 : vector<8x128xf32> to vector<8x128xbf16>
    %c0_12 = arith.constant 0 : index
    %c0_13 = arith.constant 0 : index
    %18 = vector.load %arg6[%c0_12, %c0_13] : memref<128x128xbf16, #tpu.memory_space<vmem>>, vector<128x128xbf16>
    %cst_14 = arith.constant dense<0.000000e+00> : vector<8x128xf32>
    %19 = tpu.matmul %17, %18, %cst_14 {dimension_numbers = #tpu.dot_dimension_numbers<[1], [0], [0], [1], [0, 0, 1, 1], [], []>} : vector<8x128xbf16>, vector<128x128xbf16>, vector<8x128xf32> -> vector<8x128xf32>
    %c0_15 = arith.constant 0 : index
    %c0_16 = arith.constant 0 : index
    %20 = vector.load %arg7[%c0_15, %c0_16] : memref<1x128xf32, #tpu.memory_space<vmem>>, vector<1x128xf32>
    %21 = vector.broadcast %20 : vector<1x128xf32> to vector<8x128xf32>
    %22 = arith.addf %19, %21 : vector<8x128xf32>
    %c0_17 = arith.constant 0 : index
    %c0_18 = arith.constant 0 : index
    %23 = vector.load %arg8[%c0_17, %c0_18] : memref<8x128xf32, #tpu.memory_space<vmem>>, vector<8x128xf32>
    tpu.vector_store %arg8[%c0_17, %c0_18], %22 {strides = array<i32>} : memref<8x128xf32, #tpu.memory_space<vmem>>, vector<8x128xf32>,
    return
  }
  func.func @transform_0(%arg0: i32) -> (i32, i32) {
    %c0_i32 = arith.constant 0 : i32
    %c0_i32_0 = arith.constant 0 : i32
    return %arg0, %c0_i32 : i32, i32
  }
  func.func @transform_1(%arg0: i32) -> (i32, i32) {
    %c0_i32 = arith.constant 0 : i32
    %c0_i32_0 = arith.constant 0 : i32
    %c0_i32_1 = arith.constant 0 : i32
    return %c0_i32, %c0_i32_0 : i32, i32
  }
  func.func @transform_2(%arg0: i32) -> (i32, i32) {
    %c0_i32 = arith.constant 0 : i32
    %c0_i32_0 = arith.constant 0 : i32
    %c0_i32_1 = arith.constant 0 : i32
    return %c0_i32, %c0_i32_0 : i32, i32
  }
  func.func @transform_3(%arg0: i32) -> (i32, i32) {
    %c0_i32 = arith.constant 0 : i32
    %c0_i32_0 = arith.constant 0 : i32
    %c0_i32_1 = arith.constant 0 : i32
    return %c0_i32, %c0_i32_0 : i32, i32
  }
  func.func @transform_4(%arg0: i32) -> (i32, i32) {
    %c0_i32 = arith.constant 0 : i32
    %c0_i32_0 = arith.constant 0 : i32
    %c0_i32_1 = arith.constant 0 : i32
    return %c0_i32, %c0_i32_0 : i32, i32
  }
  func.func @transform_5(%arg0: i32) -> (i32, i32) {
    %c0_i32 = arith.constant 0 : i32
    %c0_i32_0 = arith.constant 0 : i32
    %c0_i32_1 = arith.constant 0 : i32
    return %c0_i32, %c0_i32_0 : i32, i32
  }
  func.func @transform_6(%arg0: i32) -> (i32, i32) {
    %c0_i32 = arith.constant 0 : i32
    %c0_i32_0 = arith.constant 0 : i32
    %c0_i32_1 = arith.constant 0 : i32
    return %c0_i32, %c0_i32_0 : i32, i32
  }
  func.func @transform_7(%arg0: i32) -> (i32, i32) {
    %c0_i32 = arith.constant 0 : i32
    %c0_i32_0 = arith.constant 0 : i32
    return %arg0, %c0_i32 : i32, i32
  }
}

</mosaic_0001>

<bundles_post_ra>
// kernel: adversarial_network_forward.1
= control target key start
LH: loop header
LB: loop body
LE: loop exit
PB: predicated region body
PF: predicated region fallthrough
CT: control target
= control target key end

     0   :  { %12 = vsyncpa [#allocation3], 0  ;;  %s602_s0 = inlined_call_operand.vmem [shape: f32[8,128], index: 0, kind: input, shape index: {}]   ;;  %s603_s1 = inlined_call_operand.hbm [shape: bf16[128,128], index: 1, kind: input, shape index: {}]   ;;  %s604_s2 = inlined_call_operand.vmem [shape: f32[1,128], index: 2, kind: input, shape index: {}]   ;;  %s605_s3 = inlined_call_operand.hbm [shape: bf16[128,128], index: 3, kind: input, shape index: {}]   ;;  %s606_s4 = inlined_call_operand.vmem [shape: f32[1,128], index: 4, kind: input, shape index: {}]   ;;  %s607_s5 = inlined_call_operand.hbm [shape: bf16[128,128], index: 5, kind: input, shape index: {}]   ;;  %s608_s6 = inlined_call_operand.vmem [shape: f32[1,128], index: 6, kind: input, shape index: {}]   ;;  %s609_s7 = inlined_call_operand.vmem [shape: f32[8,128], index: 7, kind: output, shape index: {}]  }
   0x1   :  { %13 = vsyncpa [#allocation5], 0  ;;  %s35_s26 = sshll.u32 %s605_s3, 4  ;;  %s533_s27 = smov [#allocation4]   ;;  %s36_s26 = int_to_ptr.hbm [resolvable:$true] %s35_s26 }
   0x2   :  { %s37_s28 = sshll.u32 %s533_s27, 4  ;;  %s20_s8 = sshll.u32 %s603_s1, 4  ;;  %s38_s28 = int_to_ptr.vmem [resolvable:$true] %s37_s28  ;;  %s21_s8 = int_to_ptr.hbm [resolvable:$true] %s20_s8 }
   0x3   :  { %s534_s9 = smov 64   ;;  %s535_s10 = smov 4  }
   0x4   :  { %43 = dma.hbm_to_vmem [thread:$0]  %s36_s26, 1024, %s38_s28, [#allocation5], %s534_s9, %s534_s9, %s535_s10  }
   0x5   :  { %s536_s11 = smov [#allocation2]   ;;  %s50_s15 = sshll.u32 %s607_s5, 4  ;;  %s51_s15 = int_to_ptr.hbm [resolvable:$true] %s50_s15 }
   0x6   :  { %s22_s12 = sshll.u32 %s536_s11, 4  ;;  %s537_s3 = smov [#allocation6]   ;;  %s23_s12 = int_to_ptr.vmem [resolvable:$true] %s22_s12 }
   0x7   :  { %28 = dma.hbm_to_vmem [thread:$0]  %s21_s8, 1024, %s23_s12, [#allocation3], %s534_s9, %s534_s9, %s535_s10  }
   0x8   :  { %s52_s16 = sshll.u32 %s537_s3, 4  ;;  %s53_s16 = int_to_ptr.vmem [resolvable:$true] %s52_s16 }
   0x9   :  { %58 = dma.hbm_to_vmem [thread:$0]  %s51_s15, 1024, %s53_s16, [#allocation5], %s534_s9, %s534_s9, %s535_s10  }
   0xa   :  { %529 = dma.done.wait [#allocation3], 1024  }
   0xb   :  { %530 = vsyncadd [#allocation3], 4294966272 }
   0xc   :  { %531 = dma.done.wait [#allocation5], 2048  }
   0xd   :  { %532 = vsyncadd [#allocation5], 4294965248  ;;  %v432_v0 = vld [vmem:[#allocation2 + $0x38] sm:$0xff]  ;;  %v431_v1 = vld [vmem:[#allocation2 + $0x30] sm:$0xff] }
   0xe   :  { %143 = vmatpush.bf16.msra.mxu0 %v432_v0  ;;  %v440_v2 = vld [vmem:[#allocation4 + $0x38] sm:$0xff]  ;;  %v439_v3 = vld [vmem:[#allocation4 + $0x30] sm:$0xff]  ;;  %v430_v4 = vld [vmem:[#allocation2 + $0x28] sm:$0xff] }
   0xf   :  { %226 = vmatpush.bf16.msra.mxu1 %v440_v2  ;;  %v438_v5 = vld [vmem:[#allocation4 + $0x28] sm:$0xff]  ;;  %v429_v6 = vld [vmem:[#allocation2 + $0x20] sm:$0xff]  ;;  %v428_v8 = vld [vmem:[#allocation2 + $0x18] sm:$0xff] }
  0x10   :  { %v437_v7 = vld [vmem:[#allocation4 + $0x20] sm:$0xff]  ;;  %v436_v9 = vld [vmem:[#allocation4 + $0x18] sm:$0xff]  ;;  %v427_v10 = vld [vmem:[#allocation2 + $0x10] sm:$0xff] }
  0x11   :  { %v435_v11 = vld [vmem:[#allocation4 + $0x10] sm:$0xff]  ;;  %v426_v12 = vld [vmem:[#allocation2 + $0x8] sm:$0xff]  ;;  %v425_v13 = vld [vmem:[#allocation2] sm:$0xff] }
  0x12   :  { %144 = vmatpush.bf16.msra.mxu0 %v431_v1  ;;  %v73_v14 = vld [vmem:[%s602_s0] sm:$0xff]  ;;  %v434_v16 = vld [vmem:[#allocation4 + $0x8] sm:$0xff]  ;;  %v448_v18 = vld [vmem:[#allocation6 + $0x38] sm:$0xff] }
  0x13   :  { %227 = vmatpush.bf16.msra.mxu1 %v439_v3  ;;  %v74_v15 = vpack.c.bf16 %v73_v14, %v73_v14  ;;  %v433_v17 = vld [vmem:[#allocation4] sm:$0xff]  ;;  %309 = vmatpush.bf16.msra.mxu2 %v448_v18  ;;  %v447_v19 = vld [vmem:[#allocation6 + $0x30] sm:$0xff]  ;;  %v446_v20 = vld [vmem:[#allocation6 + $0x28] sm:$0xff] }
  0x14   :  { %v445_v21 = vld [vmem:[#allocation6 + $0x20] sm:$0xff]  ;;  %v444_v22 = vld [vmem:[#allocation6 + $0x18] sm:$0xff]  ;;  %v443_v23 = vld [vmem:[#allocation6 + $0x10] sm:$0xff] }
  0x15   :  { %v454_v24 = vld [vmem:[%s604_s2] ss:$0 sm:$0xff]  ;;  %v442_v30 = vld [vmem:[#allocation6 + $0x8] sm:$0xff] }
  0x16   :  { %145 = vmatpush.bf16.msra.mxu0 %v430_v4  ;;  %v441_v31 = vld [vmem:[#allocation6] sm:$0xff] }
  0x17   :  { %228 = vmatpush.bf16.msra.mxu1 %v438_v5  ;;  %310 = vmatpush.bf16.msra.mxu2 %v447_v19  ;;  %v455_v32 = vld [vmem:[%s606_s4] ss:$0 sm:$0xff] }
  0x18   :  { %v456_v38 = vld [vmem:[%s608_s6] ss:$0 sm:$0xff] }
  0x1a   :  { %146 = vmatpush.bf16.msra.mxu0 %v429_v6 }
  0x1b   :  { %229 = vmatpush.bf16.msra.mxu1 %v437_v7  ;;  %311 = vmatpush.bf16.msra.mxu2 %v446_v20 }
  0x1e   :  { %147 = vmatpush.bf16.msra.mxu0 %v428_v8 }
  0x1f   :  { %230 = vmatpush.bf16.msra.mxu1 %v436_v9  ;;  %312 = vmatpush.bf16.msra.mxu2 %v445_v21 }
  0x22   :  { %148 = vmatpush.bf16.msra.mxu0 %v427_v10 }
  0x23   :  { %231 = vmatpush.bf16.msra.mxu1 %v435_v11  ;;  %313 = vmatpush.bf16.msra.mxu2 %v444_v22 }
  0x26   :  { %149 = vmatpush.bf16.msra.mxu0 %v426_v12 }
  0x27   :  { %232 = vmatpush.bf16.msra.mxu1 %v434_v16  ;;  %314 = vmatpush.bf16.msra.mxu2 %v443_v23 }
  0x2a   :  { %150 = vmatpush.bf16.msra.mxu0 %v425_v13 }
  0x2b   :  { %233 = vmatpush.bf16.msra.mxu1 %v433_v17  ;;  %315 = vmatpush.bf16.msra.mxu2 %v442_v30 }
  0x2d   :  { %151 = vmatmul.bf16.vlgmr.msra.gmra.mxu0 %v74_v15 }
  0x2f   :  { %316 = vmatpush.bf16.msra.mxu2 %v441_v31 }
  0xaa   :  { %v152_v25 = vpop.f32.mrf.mxu0 }
  0xab   :  { %v153_v26 = vadd.f32 %v454_v24, %v152_v25 }
  0xad   :  { %v156_v27 = vmax.f32 %v153_v26, 0.0 }
  0xaf   :  { %v157_v28 = vpack.c.bf16 %v156_v27, %v156_v27 }
  0xb1   :  { %234 = vmatmul.bf16.vlgmr.msra.gmra.mxu1 %v157_v28 }
  0xb2   :  { %v154_v29 = vpop.f32.mrf.mxu0 }
 0x12e   :  { %v235_v33 = vpop.f32.mrf.mxu1 }
 0x12f   :  { %v236_v34 = vadd.f32 %v455_v32, %v235_v33 }
 0x131   :  { %v239_v35 = vmax.f32 %v236_v34, 0.0 }
 0x133   :  { %v240_v36 = vpack.c.bf16 %v239_v35, %v239_v35 }
 0x135   :  { %317 = vmatmul.bf16.vlgmr.msra.gmra.mxu2 %v240_v36 }
 0x136   :  { %v237_v37 = vpop.f32.mrf.mxu1 }
 0x1b8   :  { %v318_v39 = vpop.f32.mrf.mxu2 }
 0x1b9   :  { %v319_v40 = vadd.f32 %v456_v38, %v318_v39 }
 0x1bb   :  { %322 = vst [vmem:[%s609_s7] sm:$0xff] %v319_v40 }
 0x1c0   :  { %v320_v41 = vpop.f32.mrf.mxu2 }
 0x1c1   :  { %327 = vsyncpa [#allocation3], 1 }
 0x1c2   :  { %328 = vsyncpa [#allocation5], 1 }

// kernel: adversarial_network_forward.1
= control target key start
LH: loop header
LB: loop body
LE: loop exit
PB: predicated region body
PF: predicated region fallthrough
CT: control target
= control target key end

     0   :  { %12 = vsyncpa [#allocation3], 0  ;;  %s602_s0 = inlined_call_operand.vmem [shape: f32[8,128], index: 0, kind: input, shape index: {}]   ;;  %s603_s1 = inlined_call_operand.hbm [shape: bf16[128,128], index: 1, kind: input, shape index: {}]   ;;  %s604_s2 = inlined_call_operand.vmem [shape: f32[1,128], index: 2, kind: input, shape index: {}]   ;;  %s605_s3 = inlined_call_operand.hbm [shape: bf16[128,128], index: 3, kind: input, shape index: {}]   ;;  %s606_s4 = inlined_call_operand.vmem [shape: f32[1,128], index: 4, kind: input, shape index: {}]   ;;  %s607_s5 = inlined_call_operand.hbm [shape: bf16[128,128], index: 5, kind: input, shape index: {}]   ;;  %s608_s6 = inlined_call_operand.vmem [shape: f32[1,128], index: 6, kind: input, shape index: {}]   ;;  %s609_s7 = inlined_call_operand.vmem [shape: f32[8,128], index: 7, kind: output, shape index: {}]  }
   0x1   :  { %13 = vsyncpa [#allocation5], 0  ;;  %s35_s26 = sshll.u32 %s605_s3, 4  ;;  %s533_s27 = smov [#allocation4]   ;;  %s36_s26 = int_to_ptr.hbm [resolvable:$true] %s35_s26 }
   0x2   :  { %s37_s28 = sshll.u32 %s533_s27, 4  ;;  %s20_s8 = sshll.u32 %s603_s1, 4  ;;  %s38_s28 = int_to_ptr.vmem [resolvable:$true] %s37_s28  ;;  %s21_s8 = int_to_ptr.hbm [resolvable:$true] %s20_s8 }
   0x3   :  { %s534_s9 = smov 64   ;;  %s535_s10 = smov 4  }
   0x4   :  { %43 = dma.hbm_to_vmem [thread:$0]  %s36_s26, 1024, %s38_s28, [#allocation5], %s534_s9, %s534_s9, %s535_s10  }
   0x5   :  { %s536_s11 = smov [#allocation2]   ;;  %s50_s15 = sshll.u32 %s607_s5, 4  ;;  %s51_s15 = int_to_ptr.hbm [resolvable:$true] %s50_s15 }
   0x6   :  { %s22_s12 = sshll.u32 %s536_s11, 4  ;;  %s537_s3 = smov [#allocation6]   ;;  %s23_s12 = int_to_ptr.vmem [resolvable:$true] %s22_s12 }
   0x7   :  { %28 = dma.hbm_to_vmem [thread:$0]  %s21_s8, 1024, %s23_s12, [#allocation3], %s534_s9, %s534_s9, %s535_s10  }
   0x8   :  { %s52_s16 = sshll.u32 %s537_s3, 4  ;;  %s53_s16 = int_to_ptr.vmem [resolvable:$true] %s52_s16 }
   0x9   :  { %58 = dma.hbm_to_vmem [thread:$0]  %s51_s15, 1024, %s53_s16, [#allocation5], %s534_s9, %s534_s9, %s535_s10  }
   0xa   :  { %529 = dma.done.wait [#allocation3], 1024  }
   0xb   :  { %530 = vsyncadd [#allocation3], 4294966272 }
   0xc   :  { %531 = dma.done.wait [#allocation5], 2048  }
   0xd   :  { %532 = vsyncadd [#allocation5], 4294965248  ;;  %v432_v0 = vld [vmem:[#allocation2 + $0x38] sm:$0xff]  ;;  %v431_v1 = vld [vmem:[#allocation2 + $0x30] sm:$0xff] }
   0xe   :  { %143 = vmatpush.bf16.msra.mxu0 %v432_v0  ;;  %v440_v2 = vld [vmem:[#allocation4 + $0x38] sm:$0xff]  ;;  %v439_v3 = vld [vmem:[#allocation4 + $0x30] sm:$0xff]  ;;  %v430_v4 = vld [vmem:[#allocation2 + $0x28] sm:$0xff] }
   0xf   :  { %226 = vmatpush.bf16.msra.mxu1 %v440_v2  ;;  %v438_v5 = vld [vmem:[#allocation4 + $0x28] sm:$0xff]  ;;  %v429_v6 = vld [vmem:[#allocation2 + $0x20] sm:$0xff]  ;;  %v428_v8 = vld [vmem:[#allocation2 + $0x18] sm:$0xff] }
  0x10   :  { %v437_v7 = vld [vmem:[#allocation4 + $0x20] sm:$0xff]  ;;  %v436_v9 = vld [vmem:[#allocation4 + $0x18] sm:$0xff]  ;;  %v427_v10 = vld [vmem:[#allocation2 + $0x10] sm:$0xff] }
  0x11   :  { %v435_v11 = vld [vmem:[#allocation4 + $0x10] sm:$0xff]  ;;  %v426_v12 = vld [vmem:[#allocation2 + $0x8] sm:$0xff]  ;;  %v425_v13 = vld [vmem:[#allocation2] sm:$0xff] }
  0x12   :  { %144 = vmatpush.bf16.msra.mxu0 %v431_v1  ;;  %v73_v14 = vld [vmem:[%s602_s0] sm:$0xff]  ;;  %v434_v16 = vld [vmem:[#allocation4 + $0x8] sm:$0xff]  ;;  %v448_v18 = vld [vmem:[#allocation6 + $0x38] sm:$0xff] }
  0x13   :  { %227 = vmatpush.bf16.msra.mxu1 %v439_v3  ;;  %v74_v15 = vpack.c.bf16 %v73_v14, %v73_v14  ;;  %v433_v17 = vld [vmem:[#allocation4] sm:$0xff]  ;;  %309 = vmatpush.bf16.msra.mxu2 %v448_v18  ;;  %v447_v19 = vld [vmem:[#allocation6 + $0x30] sm:$0xff]  ;;  %v446_v20 = vld [vmem:[#allocation6 + $0x28] sm:$0xff] }
  0x14   :  { %v445_v21 = vld [vmem:[#allocation6 + $0x20] sm:$0xff]  ;;  %v444_v22 = vld [vmem:[#allocation6 + $0x18] sm:$0xff]  ;;  %v443_v23 = vld [vmem:[#allocation6 + $0x10] sm:$0xff] }
  0x15   :  { %v454_v24 = vld [vmem:[%s604_s2] ss:$0 sm:$0xff]  ;;  %v442_v30 = vld [vmem:[#allocation6 + $0x8] sm:$0xff] }
  0x16   :  { %145 = vmatpush.bf16.msra.mxu0 %v430_v4  ;;  %v441_v31 = vld [vmem:[#allocation6] sm:$0xff] }
  0x17   :  { %228 = vmatpush.bf16.msra.mxu1 %v438_v5  ;;  %310 = vmatpush.bf16.msra.mxu2 %v447_v19  ;;  %v455_v32 = vld [vmem:[%s606_s4] ss:$0 sm:$0xff] }
  0x18   :  { %v456_v38 = vld [vmem:[%s608_s6] ss:$0 sm:$0xff] }
  0x1a   :  { %146 = vmatpush.bf16.msra.mxu0 %v429_v6 }
  0x1b   :  { %229 = vmatpush.bf16.msra.mxu1 %v437_v7  ;;  %311 = vmatpush.bf16.msra.mxu2 %v446_v20 }
  0x1e   :  { %147 = vmatpush.bf16.msra.mxu0 %v428_v8 }
  0x1f   :  { %230 = vmatpush.bf16.msra.mxu1 %v436_v9  ;;  %312 = vmatpush.bf16.msra.mxu2 %v445_v21 }
  0x22   :  { %148 = vmatpush.bf16.msra.mxu0 %v427_v10 }
  0x23   :  { %231 = vmatpush.bf16.msra.mxu1 %v435_v11  ;;  %313 = vmatpush.bf16.msra.mxu2 %v444_v22 }
  0x26   :  { %149 = vmatpush.bf16.msra.mxu0 %v426_v12 }
  0x27   :  { %232 = vmatpush.bf16.msra.mxu1 %v434_v16  ;;  %314 = vmatpush.bf16.msra.mxu2 %v443_v23 }
  0x2a   :  { %150 = vmatpush.bf16.msra.mxu0 %v425_v13 }
  0x2b   :  { %233 = vmatpush.bf16.msra.mxu1 %v433_v17  ;;  %315 = vmatpush.bf16.msra.mxu2 %v442_v30 }
  0x2d   :  { %151 = vmatmul.bf16.vlgmr.msra.gmra.mxu0 %v74_v15 }
  0x2f   :  { %316 = vmatpush.bf16.msra.mxu2 %v441_v31 }
  0xaa   :  { %v152_v25 = vpop.f32.mrf.mxu0 }
  0xab   :  { %v153_v26 = vadd.f32 %v454_v24, %v152_v25 }
  0xad   :  { %v156_v27 = vmax.f32 %v153_v26, 0.0 }
  0xaf   :  { %v157_v28 = vpack.c.bf16 %v156_v27, %v156_v27 }
  0xb1   :  { %234 = vmatmul.bf16.vlgmr.msra.gmra.mxu1 %v157_v28 }
  0xb2   :  { %v154_v29 = vpop.f32.mrf.mxu0 }
 0x12e   :  { %v235_v33 = vpop.f32.mrf.mxu1 }
 0x12f   :  { %v236_v34 = vadd.f32 %v455_v32, %v235_v33 }
 0x131   :  { %v239_v35 = vmax.f32 %v236_v34, 0.0 }
 0x133   :  { %v240_v36 = vpack.c.bf16 %v239_v35, %v239_v35 }
 0x135   :  { %317 = vmatmul.bf16.vlgmr.msra.gmra.mxu2 %v240_v36 }
 0x136   :  { %v237_v37 = vpop.f32.mrf.mxu1 }
 0x1b8   :  { %v318_v39 = vpop.f32.mrf.mxu2 }
 0x1b9   :  { %v319_v40 = vadd.f32 %v456_v38, %v318_v39 }
 0x1bb   :  { %322 = vst [vmem:[%s609_s7] sm:$0xff] %v319_v40 }
 0x1c0   :  { %v320_v41 = vpop.f32.mrf.mxu2 }
 0x1c1   :  { %327 = vsyncpa [#allocation3], 1 }
 0x1c2   :  { %328 = vsyncpa [#allocation5], 1 }

</bundles_post_ra>
